<compile_context>
chip_gen: v6e
topology: v6e:2x2x1
jax: 0.10.0
libtpu: 0.0.40
codegen_flags: <defaults>
</compile_context>

<pallas_src>
import functools
import math

import jax
import jax.numpy as jnp
from jax.experimental import pallas as pl
from jax.experimental.pallas import tpu as pltpu

BATCH = 2
SEQ = 8
N_HEADS = 4
EMBED = 32
D_HEAD = EMBED // N_HEADS
EPS = 1e-5  # nn.LayerNorm default


def _layernorm(v, g, b):
    mu = jnp.mean(v, axis=-1, keepdims=True)
    var = jnp.mean((v - mu) ** 2, axis=-1, keepdims=True)
    return (v - mu) * jax.lax.rsqrt(var + EPS) * g + b


def clip_layer_kernel(x_ref, mask_ref,
                      ln1_g_ref, ln1_b_ref,
                      wq_ref, bq_ref, wkt_ref, bkt_ref, wv_ref, bv_ref,
                      w_out_ref, b_out_ref,
                      ln2_g_ref, ln2_b_ref,
                      w1_ref, b1_ref, w2_ref, b2_ref,
                      o_ref,
                      *, n_heads, matmul_dtype):
    """One grid step = one batch element: x_ref is (S, D)."""
    f32 = jnp.float32
    x = x_ref[...]                                        # (S, D)
    S, D = x.shape

    # ---- residual 1 + LayerNorm1 (f32 elementwise) ---------------------------
    residual = x
    h = _layernorm(x, ln1_g_ref[...], ln1_b_ref[...])
    hc = h.astype(matmul_dtype)

    # ---- Self-attention ------------------------------------------------------
    # Head-batched canonical matmuls: no in-kernel column slices/stacks.
    # The 1/sqrt(d_head) scale is already folded into wq/bq wrapper-side.
    h_b = jnp.broadcast_to(hc, (n_heads, S, D))           # (H, S, D)
    hT_b = jnp.broadcast_to(hc.T, (n_heads, D, S))        # (H, D, S) — one 2D transpose

    q_h = jnp.einsum('hsd,hde->hse', h_b, wq_ref[...].astype(matmul_dtype),
                     preferred_element_type=f32) + bq_ref[...]        # (H, S, dh)
    k_ht = jnp.einsum('hed,hds->hes', wkt_ref[...].astype(matmul_dtype), hT_b,
                      preferred_element_type=f32) + bkt_ref[...]      # (H, dh, S)
    v_h = jnp.einsum('hsd,hde->hse', h_b, wv_ref[...].astype(matmul_dtype),
                     preferred_element_type=f32) + bv_ref[...]        # (H, S, dh)

    # Scores: plain (q)(k^T) batched MXU matmul; additive causal mask (0/-1e30)
    # is precomputed wrapper-side and broadcast over heads with one add.
    scores = jnp.einsum('hqe,hes->hqs', q_h.astype(matmul_dtype),
                        k_ht.astype(matmul_dtype),
                        preferred_element_type=f32)                   # (H, S, S)
    scores = scores + mask_ref[...]

    m = jnp.max(scores, axis=-1, keepdims=True)
    p = jnp.exp(scores - m)
    denom = jnp.sum(p, axis=-1, keepdims=True)            # >= 1 (diagonal unmasked)
    p = p * pl.reciprocal(denom, approx=True)              # EUP slot

    attn_h = jnp.einsum('hqs,hsd->hqd', p.astype(matmul_dtype),
                        v_h.astype(matmul_dtype),
                        preferred_element_type=f32)                   # (H, S, dh)

    # out_proj: concat heads once (single lane relayout), then one deep
    # (S, D) @ (D, D) matmul — no (H, S, D) intermediate, no leading-axis sum.
    attn_cat = jnp.concatenate([attn_h[i] for i in range(n_heads)], axis=-1)  # (S, D)
    attn = jnp.dot(attn_cat.astype(matmul_dtype), w_out_ref[...].astype(matmul_dtype),
                   preferred_element_type=f32) + b_out_ref[...]

    x1 = attn + residual

    # ---- residual 2 + LayerNorm2 + MLP (QuickGELU) ---------------------------
    # Elementwise (LN, sigmoid) stays f32; only matmul operands take matmul_dtype.
    residual2 = x1
    h2 = _layernorm(x1, ln2_g_ref[...], ln2_b_ref[...])
    h2 = jnp.dot(h2.astype(matmul_dtype), w1_ref[...].astype(matmul_dtype),
                 preferred_element_type=f32) + b1_ref[...]
    h2 = h2 * jax.nn.sigmoid(1.702 * h2)
    h2 = jnp.dot(h2.astype(matmul_dtype), w2_ref[...].astype(matmul_dtype),
                 preferred_element_type=f32) + b2_ref[...]

    o_ref[...] = (h2 + residual2).astype(o_ref.dtype)


def clip_layer(x, params, n_heads=N_HEADS, *, matmul_dtype=jnp.float32):
    B, S, D = x.shape
    dh = D // n_heads
    (ln1_g, ln1_b, w_in, b_in, w_out, b_out,
     ln2_g, ln2_b, w1, b1, w2, b2) = params

    # ---- wrapper-side weight prep (free in XLA) ------------------------------
    scale = 1.0 / math.sqrt(dh)
    wq, wk, wv = w_in[:, :D], w_in[:, D:2 * D], w_in[:, 2 * D:]
    bq, bk, bv = b_in[:, :D], b_in[:, D:2 * D], b_in[:, 2 * D:]

    wq_h = (wq * scale).reshape(D, n_heads, dh).transpose(1, 0, 2)   # (H, D, dh), scale folded
    bq_h = (bq * scale).reshape(n_heads, dh)[:, None, :]             # (H, 1, dh)
    wkt_h = wk.reshape(D, n_heads, dh).transpose(1, 2, 0)            # (H, dh, D) — k pre-transposed
    bkt_h = bk.reshape(n_heads, dh)[:, :, None]                      # (H, dh, 1)
    wv_h = wv.reshape(D, n_heads, dh).transpose(1, 0, 2)             # (H, D, dh)
    bv_h = bv.reshape(n_heads, dh)[:, None, :]                       # (H, 1, dh)

    # Additive causal mask, finite (-1e30) so fully-masked padded rows (if S is
    # ever padded to 128 lanes at real CLIP size) stay NaN-free.
    causal = jnp.triu(jnp.ones((S, S), dtype=bool), k=1)
    mask_add = jnp.where(causal, jnp.float32(-1e30), jnp.float32(0.0))

    operands = (x, mask_add, ln1_g, ln1_b,
                wq_h, bq_h, wkt_h, bkt_h, wv_h, bv_h,
                w_out, b_out, ln2_g, ln2_b, w1, b1, w2, b2)

    def const_spec(a):
        nd = a.ndim
        return pl.BlockSpec(a.shape, lambda b: (0,) * nd)

    # x / output: one batch element per grid step. Weights/mask: constant-index
    # blocks — DMA'd once, resident across all grid steps.
    in_specs = [pl.BlockSpec((None, S, D), lambda b: (b, 0, 0))]
    in_specs += [const_spec(a) for a in operands[1:]]

    kernel = functools.partial(clip_layer_kernel,
                               n_heads=n_heads, matmul_dtype=matmul_dtype)

    out = pl.pallas_call(
        kernel,
        out_shape=jax.ShapeDtypeStruct((B, S, D), x.dtype),
        grid=(B,),
        in_specs=in_specs,
        out_specs=pl.BlockSpec((None, S, D), lambda b: (b, 0, 0)),
        compiler_params=pltpu.CompilerParams(
            # "parallel" batch axis → megacore sharding on v7x (2 TCs/chip).
            dimension_semantics=("parallel",),
            # Toy size needs < 1 MiB; 32 MiB is safe on every generation.  At
            # real CLIP size (D=768) raise this on v5e/v6e (128 MiB parts) and
            # additionally tile the MLP over rows (256-row tiles for the
            # 256-wide MXU) on v7x, with matmul_dtype=jnp.bfloat16.
            vmem_limit_bytes=32 * 1024 * 1024),
    )(*operands)
    return out


def init_params(key, d):
    ks = jax.random.split(key, 12)
    s = 0.02
    ln1_g = jnp.ones((1, d), jnp.float32)
    ln1_b = jnp.zeros((1, d), jnp.float32)
    # Linear weights stored pre-transposed: y = x @ W + b, W: (in, out)
    w_in = jax.random.normal(ks[0], (d, 3 * d), jnp.float32) * s
    b_in = jax.random.normal(ks[1], (1, 3 * d), jnp.float32) * s
    w_out = jax.random.normal(ks[2], (d, d), jnp.float32) * s
    b_out = jax.random.normal(ks[3], (1, d), jnp.float32) * s
    ln2_g = jnp.ones((1, d), jnp.float32)
    ln2_b = jnp.zeros((1, d), jnp.float32)
    w1 = jax.random.normal(ks[4], (d, 4 * d), jnp.float32) * s
    b1 = jax.random.normal(ks[5], (1, 4 * d), jnp.float32) * s
    w2 = jax.random.normal(ks[6], (4 * d, d), jnp.float32) * s
    b2 = jax.random.normal(ks[7], (1, d), jnp.float32) * s
    return (ln1_g, ln1_b, w_in, b_in, w_out, b_out, ln2_g, ln2_b, w1, b1, w2, b2)


def clip_layer_ref(x, params):
    (ln1_g, ln1_b, w_in, b_in, w_out, b_out,
     ln2_g, ln2_b, w1, b1, w2, b2) = params
    B, S, D = x.shape

    def ln(v, g, b):
        mu = jnp.mean(v, axis=-1, keepdims=True)
        var = jnp.mean((v - mu) ** 2, axis=-1, keepdims=True)
        return (v - mu) / jnp.sqrt(var + EPS) * g + b

    residual = x
    h = ln(x, ln1_g, ln1_b)
    qkv = h @ w_in + b_in
    q, k, v = jnp.split(qkv, 3, axis=-1)
    q = q.reshape(B, S, N_HEADS, D_HEAD).transpose(0, 2, 1, 3)
    k = k.reshape(B, S, N_HEADS, D_HEAD).transpose(0, 2, 1, 3)
    v = v.reshape(B, S, N_HEADS, D_HEAD).transpose(0, 2, 1, 3)
    scores = jnp.einsum("bhqd,bhkd->bhqk", q, k)
    mask = jnp.triu(jnp.ones((S, S), bool), k=1)
    scores = jnp.where(mask, -jnp.inf, scores) / math.sqrt(D_HEAD)
    p = jax.nn.softmax(scores, axis=-1)
    o = jnp.einsum("bhqk,bhkd->bhqd", p, v).transpose(0, 2, 1, 3).reshape(B, S, D)
    o = o @ w_out + b_out
    x1 = o + residual
    residual2 = x1
    h2 = ln(x1, ln2_g, ln2_b)
    h2 = h2 @ w1 + b1
    h2 = h2 * jax.nn.sigmoid(1.702 * h2)
    h2 = h2 @ w2 + b2
    return h2 + residual2


if __name__ == "__main__":
    key = jax.random.PRNGKey(0)
    kx, kp = jax.random.split(key)
    x = jax.random.normal(kx, (BATCH, SEQ, EMBED), jnp.float32)
    params = init_params(kp, EMBED)

    out = clip_layer(x, params)
    out = jax.block_until_ready(out)

    ref = clip_layer_ref(x, params)
    assert out.shape == (BATCH, SEQ, EMBED)
    # Tolerance slightly looser than pure-f32 because the softmax denominator
    # uses the EUP approximate reciprocal (pl.reciprocal(approx=True)).
    assert jnp.allclose(out, ref, atol=5e-4, rtol=5e-4), \
        f"max err {float(jnp.max(jnp.abs(out - ref)))}"
    print("KERNEL_OK")
</pallas_src>

<mosaic_0001>
module attributes {stable_mosaic.version = 11 : i64} {
  func.func @clip_layer_kernel(%arg0: i32, %arg1: memref<1x8x32xf32, #tpu.memory_space<vmem>>, %arg2: memref<8x8xf32, #tpu.memory_space<vmem>>, %arg3: memref<1x32xf32, #tpu.memory_space<vmem>>, %arg4: memref<1x32xf32, #tpu.memory_space<vmem>>, %arg5: memref<4x32x8xf32, #tpu.memory_space<vmem>>, %arg6: memref<4x1x8xf32, #tpu.memory_space<vmem>>, %arg7: memref<4x8x32xf32, #tpu.memory_space<vmem>>, %arg8: memref<4x8x1xf32, #tpu.memory_space<vmem>>, %arg9: memref<4x32x8xf32, #tpu.memory_space<vmem>>, %arg10: memref<4x1x8xf32, #tpu.memory_space<vmem>>, %arg11: memref<32x32xf32, #tpu.memory_space<vmem>>, %arg12: memref<1x32xf32, #tpu.memory_space<vmem>>, %arg13: memref<1x32xf32, #tpu.memory_space<vmem>>, %arg14: memref<1x32xf32, #tpu.memory_space<vmem>>, %arg15: memref<32x128xf32, #tpu.memory_space<vmem>>, %arg16: memref<1x128xf32, #tpu.memory_space<vmem>>, %arg17: memref<128x32xf32, #tpu.memory_space<vmem>>, %arg18: memref<1x32xf32, #tpu.memory_space<vmem>>, %arg19: memref<1x8x32xf32, #tpu.memory_space<vmem>>) attributes {dimension_semantics = [#tpu.dimension_semantics<parallel>], iteration_bounds = array<i64: 2>, scalar_prefetch = 0 : i64, scratch_operands = 0 : i64, tpu.core_type = #tpu.core_type<tc>, window_params = [{transform_indices = @transform_0, window_bounds = array<i64: 1, 8, 32>}, {pipeline_mode = #tpu.pipeline_mode<synchronous>, transform_indices = @transform_1, window_bounds = array<i64: 8, 8>}, {pipeline_mode = #tpu.pipeline_mode<synchronous>, transform_indices = @transform_2, window_bounds = array<i64: 1, 32>}, {pipeline_mode = #tpu.pipeline_mode<synchronous>, transform_indices = @transform_3, window_bounds = array<i64: 1, 32>}, {pipeline_mode = #tpu.pipeline_mode<synchronous>, transform_indices = @transform_4, window_bounds = array<i64: 4, 32, 8>}, {pipeline_mode = #tpu.pipeline_mode<synchronous>, transform_indices = @transform_5, window_bounds = array<i64: 4, 1, 8>}, {pipeline_mode = #tpu.pipeline_mode<synchronous>, transform_indices = @transform_6, window_bounds = array<i64: 4, 8, 32>}, {pipeline_mode = #tpu.pipeline_mode<synchronous>, transform_indices = @transform_7, window_bounds = array<i64: 4, 8, 1>}, {pipeline_mode = #tpu.pipeline_mode<synchronous>, transform_indices = @transform_8, window_bounds = array<i64: 4, 32, 8>}, {pipeline_mode = #tpu.pipeline_mode<synchronous>, transform_indices = @transform_9, window_bounds = array<i64: 4, 1, 8>}, {pipeline_mode = #tpu.pipeline_mode<synchronous>, transform_indices = @transform_10, window_bounds = array<i64: 32, 32>}, {pipeline_mode = #tpu.pipeline_mode<synchronous>, transform_indices = @transform_11, window_bounds = array<i64: 1, 32>}, {pipeline_mode = #tpu.pipeline_mode<synchronous>, transform_indices = @transform_12, window_bounds = array<i64: 1, 32>}, {pipeline_mode = #tpu.pipeline_mode<synchronous>, transform_indices = @transform_13, window_bounds = array<i64: 1, 32>}, {pipeline_mode = #tpu.pipeline_mode<synchronous>, transform_indices = @transform_14, window_bounds = array<i64: 32, 128>}, {pipeline_mode = #tpu.pipeline_mode<synchronous>, transform_indices = @transform_15, window_bounds = array<i64: 1, 128>}, {pipeline_mode = #tpu.pipeline_mode<synchronous>, transform_indices = @transform_16, window_bounds = array<i64: 128, 32>}, {pipeline_mode = #tpu.pipeline_mode<synchronous>, transform_indices = @transform_17, window_bounds = array<i64: 1, 32>}, {transform_indices = @transform_18, window_bounds = array<i64: 1, 8, 32>}]} {
    %c0 = arith.constant 0 : index
    %c0_0 = arith.constant 0 : index
    %c0_1 = arith.constant 0 : index
    %0 = vector.load %arg1[%c0, %c0_0, %c0_1] : memref<1x8x32xf32, #tpu.memory_space<vmem>>, vector<1x8x32xf32>
    %1 = vector.shape_cast %0 : vector<1x8x32xf32> to vector<8x32xf32>
    %c0_2 = arith.constant 0 : index
    %c0_3 = arith.constant 0 : index
    %2 = vector.load %arg3[%c0_2, %c0_3] : memref<1x32xf32, #tpu.memory_space<vmem>>, vector<1x32xf32>
    %c0_4 = arith.constant 0 : index
    %c0_5 = arith.constant 0 : index
    %3 = vector.load %arg4[%c0_4, %c0_5] : memref<1x32xf32, #tpu.memory_space<vmem>>, vector<1x32xf32>
    %cst = arith.constant dense<0.000000e+00> : vector<8xf32>
    %4 = vector.multi_reduction <add>, %1, %cst [1] : vector<8x32xf32> to vector<8xf32>
    %5 = vector.shape_cast %4 : vector<8xf32> to vector<8x1xf32>
    %cst_6 = arith.constant 3.200000e+01 : f32
    %6 = vector.broadcast %cst_6 : f32 to vector<8x1xf32>
    %7 = arith.divf %5, %6 : vector<8x1xf32>
    %8 = vector.broadcast %7 : vector<8x1xf32> to vector<8x32xf32>
    %9 = arith.subf %1, %8 : vector<8x32xf32>
    %10 = arith.mulf %9, %9 : vector<8x32xf32>
    %cst_7 = arith.constant dense<0.000000e+00> : vector<8xf32>
    %11 = vector.multi_reduction <add>, %10, %cst_7 [1] : vector<8x32xf32> to vector<8xf32>
    %12 = vector.shape_cast %11 : vector<8xf32> to vector<8x1xf32>
    %cst_8 = arith.constant 3.200000e+01 : f32
    %13 = vector.broadcast %cst_8 : f32 to vector<8x1xf32>
    %14 = arith.divf %12, %13 : vector<8x1xf32>
    %15 = vector.broadcast %7 : vector<8x1xf32> to vector<8x32xf32>
    %16 = arith.subf %1, %15 : vector<8x32xf32>
    %cst_9 = arith.constant 9.99999974E-6 : f32
    %17 = vector.broadcast %cst_9 : f32 to vector<8x1xf32>
    %18 = arith.addf %14, %17 : vector<8x1xf32>
    %19 = math.rsqrt %18 : vector<8x1xf32>
    %20 = vector.broadcast %19 : vector<8x1xf32> to vector<8x32xf32>
    %21 = arith.mulf %16, %20 : vector<8x32xf32>
    %22 = vector.broadcast %2 : vector<1x32xf32> to vector<8x32xf32>
    %23 = arith.mulf %21, %22 : vector<8x32xf32>
    %24 = vector.broadcast %3 : vector<1x32xf32> to vector<8x32xf32>
    %25 = arith.addf %23, %24 : vector<8x32xf32>
    %26 = vector.shape_cast %25 : vector<8x32xf32> to vector<1x8x32xf32>
    %27 = vector.broadcast %26 : vector<1x8x32xf32> to vector<4x8x32xf32>
    %28 = tpu.transpose %25, [1, 0] : vector<8x32xf32> -> vector<32x8xf32>
    %29 = vector.shape_cast %28 : vector<32x8xf32> to vector<1x32x8xf32>
    %30 = vector.broadcast %29 : vector<1x32x8xf32> to vector<4x32x8xf32>
    %c0_10 = arith.constant 0 : index
    %c0_11 = arith.constant 0 : index
    %c0_12 = arith.constant 0 : index
    %31 = vector.load %arg5[%c0_10, %c0_11, %c0_12] : memref<4x32x8xf32, #tpu.memory_space<vmem>>, vector<4x32x8xf32>
    "tpu.trace_start"() <{level = 10 : i32, message = "hsd,hde->hse"}> : () -> ()
    %cst_13 = arith.constant dense<0.000000e+00> : vector<4x8x8xf32>
    %32 = tpu.matmul %27, %31, %cst_13 {dimension_numbers = #tpu.dot_dimension_numbers<[2], [1], [1], [2], [0, 0, 0, 1, 1, 2], [0], [0]>} : vector<4x8x32xf32>, vector<4x32x8xf32>, vector<4x8x8xf32> -> vector<4x8x8xf32>
    "tpu.trace_stop"() : () -> ()
    %c0_14 = arith.constant 0 : index
    %c0_15 = arith.constant 0 : index
    %c0_16 = arith.constant 0 : index
    %33 = vector.load %arg6[%c0_14, %c0_15, %c0_16] : memref<4x1x8xf32, #tpu.memory_space<vmem>>, vector<4x1x8xf32>
    %34 = vector.broadcast %33 : vector<4x1x8xf32> to vector<4x8x8xf32>
    %35 = arith.addf %32, %34 : vector<4x8x8xf32>
    %c0_17 = arith.constant 0 : index
    %c0_18 = arith.constant 0 : index
    %c0_19 = arith.constant 0 : index
    %36 = vector.load %arg7[%c0_17, %c0_18, %c0_19] : memref<4x8x32xf32, #tpu.memory_space<vmem>>, vector<4x8x32xf32>
    "tpu.trace_start"() <{level = 10 : i32, message = "hed,hds->hes"}> : () -> ()
    %cst_20 = arith.constant dense<0.000000e+00> : vector<4x8x8xf32>
    %37 = tpu.matmul %36, %30, %cst_20 {dimension_numbers = #tpu.dot_dimension_numbers<[2], [1], [1], [2], [0, 0, 0, 1, 1, 2], [0], [0]>} : vector<4x8x32xf32>, vector<4x32x8xf32>, vector<4x8x8xf32> -> vector<4x8x8xf32>
    "tpu.trace_stop"() : () -> ()
    %c0_21 = arith.constant 0 : index
    %c0_22 = arith.constant 0 : index
    %c0_23 = arith.constant 0 : index
    %38 = vector.load %arg8[%c0_21, %c0_22, %c0_23] : memref<4x8x1xf32, #tpu.memory_space<vmem>>, vector<4x8x1xf32>
    %39 = vector.broadcast %38 : vector<4x8x1xf32> to vector<4x8x8xf32>
    %40 = arith.addf %37, %39 : vector<4x8x8xf32>
    %c0_24 = arith.constant 0 : index
    %c0_25 = arith.constant 0 : index
    %c0_26 = arith.constant 0 : index
    %41 = vector.load %arg9[%c0_24, %c0_25, %c0_26] : memref<4x32x8xf32, #tpu.memory_space<vmem>>, vector<4x32x8xf32>
    "tpu.trace_start"() <{level = 10 : i32, message = "hsd,hde->hse"}> : () -> ()
    %cst_27 = arith.constant dense<0.000000e+00> : vector<4x8x8xf32>
    %42 = tpu.matmul %27, %41, %cst_27 {dimension_numbers = #tpu.dot_dimension_numbers<[2], [1], [1], [2], [0, 0, 0, 1, 1, 2], [0], [0]>} : vector<4x8x32xf32>, vector<4x32x8xf32>, vector<4x8x8xf32> -> vector<4x8x8xf32>
    "tpu.trace_stop"() : () -> ()
    %c0_28 = arith.constant 0 : index
    %c0_29 = arith.constant 0 : index
    %c0_30 = arith.constant 0 : index
    %43 = vector.load %arg10[%c0_28, %c0_29, %c0_30] : memref<4x1x8xf32, #tpu.memory_space<vmem>>, vector<4x1x8xf32>
    %44 = vector.broadcast %43 : vector<4x1x8xf32> to vector<4x8x8xf32>
    %45 = arith.addf %42, %44 : vector<4x8x8xf32>
    "tpu.trace_start"() <{level = 10 : i32, message = "hqe,hes->hqs"}> : () -> ()
    %cst_31 = arith.constant dense<0.000000e+00> : vector<4x8x8xf32>
    %46 = tpu.matmul %35, %40, %cst_31 {dimension_numbers = #tpu.dot_dimension_numbers<[2], [1], [1], [2], [0, 0, 0, 1, 1, 2], [0], [0]>} : vector<4x8x8xf32>, vector<4x8x8xf32>, vector<4x8x8xf32> -> vector<4x8x8xf32>
    "tpu.trace_stop"() : () -> ()
    %c0_32 = arith.constant 0 : index
    %c0_33 = arith.constant 0 : index
    %47 = vector.load %arg2[%c0_32, %c0_33] : memref<8x8xf32, #tpu.memory_space<vmem>>, vector<8x8xf32>
    %48 = vector.shape_cast %47 : vector<8x8xf32> to vector<1x8x8xf32>
    %49 = vector.broadcast %48 : vector<1x8x8xf32> to vector<4x8x8xf32>
    %50 = arith.addf %46, %49 : vector<4x8x8xf32>
    %cst_34 = arith.constant dense<0xFF800000> : vector<4x8xf32>
    %51 = vector.multi_reduction <maximumf>, %50, %cst_34 [2] : vector<4x8x8xf32> to vector<4x8xf32>
    %52 = vector.shape_cast %51 : vector<4x8xf32> to vector<4x8x1xf32>
    %53 = vector.broadcast %52 : vector<4x8x1xf32> to vector<4x8x8xf32>
    %54 = arith.subf %50, %53 : vector<4x8x8xf32>
    %55 = math.exp %54 : vector<4x8x8xf32>
    %cst_35 = arith.constant dense<0.000000e+00> : vector<4x8xf32>
    %56 = vector.multi_reduction <add>, %55, %cst_35 [2] : vector<4x8x8xf32> to vector<4x8xf32>
    %57 = vector.shape_cast %56 : vector<4x8xf32> to vector<4x8x1xf32>
    %58 = tpu.reciprocal %57 {approx = true} : vector<4x8x1xf32> -> vector<4x8x1xf32>
    %59 = vector.broadcast %58 : vector<4x8x1xf32> to vector<4x8x8xf32>
    %60 = arith.mulf %55, %59 : vector<4x8x8xf32>
    "tpu.trace_start"() <{level = 10 : i32, message = "hqs,hsd->hqd"}> : () -> ()
    %cst_36 = arith.constant dense<0.000000e+00> : vector<4x8x8xf32>
    %61 = tpu.matmul %60, %45, %cst_36 {dimension_numbers = #tpu.dot_dimension_numbers<[2], [1], [1], [2], [0, 0, 0, 1, 1, 2], [0], [0]>} : vector<4x8x8xf32>, vector<4x8x8xf32>, vector<4x8x8xf32> -> vector<4x8x8xf32>
    "tpu.trace_stop"() : () -> ()
    %62 = vector.extract_strided_slice %61 {offsets = [0, 0, 0], sizes = [1, 8, 8], strides = [1, 1, 1]} : vector<4x8x8xf32> to vector<1x8x8xf32>
    %63 = vector.shape_cast %62 : vector<1x8x8xf32> to vector<8x8xf32>
    %64 = vector.extract_strided_slice %61 {offsets = [1, 0, 0], sizes = [1, 8, 8], strides = [1, 1, 1]} : vector<4x8x8xf32> to vector<1x8x8xf32>
    %65 = vector.shape_cast %64 : vector<1x8x8xf32> to vector<8x8xf32>
    %66 = vector.extract_strided_slice %61 {offsets = [2, 0, 0], sizes = [1, 8, 8], strides = [1, 1, 1]} : vector<4x8x8xf32> to vector<1x8x8xf32>
    %67 = vector.shape_cast %66 : vector<1x8x8xf32> to vector<8x8xf32>
    %68 = vector.extract_strided_slice %61 {offsets = [3, 0, 0], sizes = [1, 8, 8], strides = [1, 1, 1]} : vector<4x8x8xf32> to vector<1x8x8xf32>
    %69 = vector.shape_cast %68 : vector<1x8x8xf32> to vector<8x8xf32>
    %70 = tpu.concatenate %63, %65, %67, %69 in 1 : vector<8x8xf32>, vector<8x8xf32>, vector<8x8xf32>, vector<8x8xf32> -> vector<8x32xf32>
    %c0_37 = arith.constant 0 : index
    %c0_38 = arith.constant 0 : index
    %71 = vector.load %arg11[%c0_37, %c0_38] : memref<32x32xf32, #tpu.memory_space<vmem>>, vector<32x32xf32>
    %cst_39 = arith.constant dense<0.000000e+00> : vector<8x32xf32>
    %72 = tpu.matmul %70, %71, %cst_39 {dimension_numbers = #tpu.dot_dimension_numbers<[1], [0], [0], [1], [0, 0, 1, 1], [], []>} : vector<8x32xf32>, vector<32x32xf32>, vector<8x32xf32> -> vector<8x32xf32>
    %c0_40 = arith.constant 0 : index
    %c0_41 = arith.constant 0 : index
    %73 = vector.load %arg12[%c0_40, %c0_41] : memref<1x32xf32, #tpu.memory_space<vmem>>, vector<1x32xf32>
    %74 = vector.broadcast %73 : vector<1x32xf32> to vector<8x32xf32>
    %75 = arith.addf %72, %74 : vector<8x32xf32>
    %76 = arith.addf %75, %1 : vector<8x32xf32>
    %c0_42 = arith.constant 0 : index
    %c0_43 = arith.constant 0 : index
    %77 = vector.load %arg13[%c0_42, %c0_43] : memref<1x32xf32, #tpu.memory_space<vmem>>, vector<1x32xf32>
    %c0_44 = arith.constant 0 : index
    %c0_45 = arith.constant 0 : index
    %78 = vector.load %arg14[%c0_44, %c0_45] : memref<1x32xf32, #tpu.memory_space<vmem>>, vector<1x32xf32>
    %cst_46 = arith.constant dense<0.000000e+00> : vector<8xf32>
    %79 = vector.multi_reduction <add>, %76, %cst_46 [1] : vector<8x32xf32> to vector<8xf32>
    %80 = vector.shape_cast %79 : vector<8xf32> to vector<8x1xf32>
    %cst_47 = arith.constant 3.200000e+01 : f32
    %81 = vector.broadcast %cst_47 : f32 to vector<8x1xf32>
    %82 = arith.divf %80, %81 : vector<8x1xf32>
    %83 = vector.broadcast %82 : vector<8x1xf32> to vector<8x32xf32>
    %84 = arith.subf %76, %83 : vector<8x32xf32>
    %85 = arith.mulf %84, %84 : vector<8x32xf32>
    %cst_48 = arith.constant dense<0.000000e+00> : vector<8xf32>
    %86 = vector.multi_reduction <add>, %85, %cst_48 [1] : vector<8x32xf32> to vector<8xf32>
    %87 = vector.shape_cast %86 : vector<8xf32> to vector<8x1xf32>
    %cst_49 = arith.constant 3.200000e+01 : f32
    %88 = vector.broadcast %cst_49 : f32 to vector<8x1xf32>
    %89 = arith.divf %87, %88 : vector<8x1xf32>
    %90 = vector.broadcast %82 : vector<8x1xf32> to vector<8x32xf32>
    %91 = arith.subf %76, %90 : vector<8x32xf32>
    %cst_50 = arith.constant 9.99999974E-6 : f32
    %92 = vector.broadcast %cst_50 : f32 to vector<8x1xf32>
    %93 = arith.addf %89, %92 : vector<8x1xf32>
    %94 = math.rsqrt %93 : vector<8x1xf32>
    %95 = vector.broadcast %94 : vector<8x1xf32> to vector<8x32xf32>
    %96 = arith.mulf %91, %95 : vector<8x32xf32>
    %97 = vector.broadcast %77 : vector<1x32xf32> to vector<8x32xf32>
    %98 = arith.mulf %96, %97 : vector<8x32xf32>
    %99 = vector.broadcast %78 : vector<1x32xf32> to vector<8x32xf32>
    %100 = arith.addf %98, %99 : vector<8x32xf32>
    %c0_51 = arith.constant 0 : index
    %c0_52 = arith.constant 0 : index
    %101 = vector.load %arg15[%c0_51, %c0_52] : memref<32x128xf32, #tpu.memory_space<vmem>>, vector<32x128xf32>
    %cst_53 = arith.constant dense<0.000000e+00> : vector<8x128xf32>
    %102 = tpu.matmul %100, %101, %cst_53 {dimension_numbers = #tpu.dot_dimension_numbers<[1], [0], [0], [1], [0, 0, 1, 1], [], []>} : vector<8x32xf32>, vector<32x128xf32>, vector<8x128xf32> -> vector<8x128xf32>
    %c0_54 = arith.constant 0 : index
    %c0_55 = arith.constant 0 : index
    %103 = vector.load %arg16[%c0_54, %c0_55] : memref<1x128xf32, #tpu.memory_space<vmem>>, vector<1x128xf32>
    %104 = vector.broadcast %103 : vector<1x128xf32> to vector<8x128xf32>
    %105 = arith.addf %102, %104 : vector<8x128xf32>
    %cst_56 = arith.constant 1.702000e+00 : f32
    %106 = vector.broadcast %cst_56 : f32 to vector<8x128xf32>
    %107 = arith.mulf %106, %105 : vector<8x128xf32>
    %108 = arith.negf %107 : vector<8x128xf32>
    %109 = math.exp %108 : vector<8x128xf32>
    %cst_57 = arith.constant 1.000000e+00 : f32
    %110 = vector.broadcast %cst_57 : f32 to vector<8x128xf32>
    %111 = arith.addf %110, %109 : vector<8x128xf32>
    %112 = arith.divf %110, %111 : vector<8x128xf32>
    %113 = arith.mulf %105, %112 : vector<8x128xf32>
    %c0_58 = arith.constant 0 : index
    %c0_59 = arith.constant 0 : index
    %114 = vector.load %arg17[%c0_58, %c0_59] : memref<128x32xf32, #tpu.memory_space<vmem>>, vector<128x32xf32>
    %cst_60 = arith.constant dense<0.000000e+00> : vector<8x32xf32>
    %115 = tpu.matmul %113, %114, %cst_60 {dimension_numbers = #tpu.dot_dimension_numbers<[1], [0], [0], [1], [0, 0, 1, 1], [], []>} : vector<8x128xf32>, vector<128x32xf32>, vector<8x32xf32> -> vector<8x32xf32>
    %c0_61 = arith.constant 0 : index
    %c0_62 = arith.constant 0 : index
    %116 = vector.load %arg18[%c0_61, %c0_62] : memref<1x32xf32, #tpu.memory_space<vmem>>, vector<1x32xf32>
    %117 = vector.broadcast %116 : vector<1x32xf32> to vector<8x32xf32>
    %118 = arith.addf %115, %117 : vector<8x32xf32>
    %119 = arith.addf %118, %76 : vector<8x32xf32>
    %c0_63 = arith.constant 0 : index
    %c0_64 = arith.constant 0 : index
    %c0_65 = arith.constant 0 : index
    %120 = vector.load %arg19[%c0_63, %c0_64, %c0_65] : memref<1x8x32xf32, #tpu.memory_space<vmem>>, vector<1x8x32xf32>
    %121 = vector.shape_cast %120 : vector<1x8x32xf32> to vector<8x32xf32>
    %122 = vector.shape_cast %119 : vector<8x32xf32> to vector<1x8x32xf32>
    tpu.vector_store %arg19[%c0_63, %c0_64, %c0_65], %122 {strides = array<i32>} : memref<1x8x32xf32, #tpu.memory_space<vmem>>, vector<1x8x32xf32>,
    return
  }
  func.func @transform_0(%arg0: i32) -> (i32, i32, i32) {
    %c0_i32 = arith.constant 0 : i32
    %c0_i32_0 = arith.constant 0 : i32
    %c0_i32_1 = arith.constant 0 : i32
    return %arg0, %c0_i32, %c0_i32_0 : i32, i32, i32
  }
  func.func @transform_1(%arg0: i32) -> (i32, i32) {
    %c0_i32 = arith.constant 0 : i32
    %c0_i32_0 = arith.constant 0 : i32
    %c0_i32_1 = arith.constant 0 : i32
    return %c0_i32, %c0_i32_0 : i32, i32
  }
  func.func @transform_2(%arg0: i32) -> (i32, i32) {
    %c0_i32 = arith.constant 0 : i32
    %c0_i32_0 = arith.constant 0 : i32
    %c0_i32_1 = arith.constant 0 : i32
    return %c0_i32, %c0_i32_0 : i32, i32
  }
  func.func @transform_3(%arg0: i32) -> (i32, i32) {
    %c0_i32 = arith.constant 0 : i32
    %c0_i32_0 = arith.constant 0 : i32
    %c0_i32_1 = arith.constant 0 : i32
    return %c0_i32, %c0_i32_0 : i32, i32
  }
  func.func @transform_4(%arg0: i32) -> (i32, i32, i32) {
    %c0_i32 = arith.constant 0 : i32
    %c0_i32_0 = arith.constant 0 : i32
    %c0_i32_1 = arith.constant 0 : i32
    %c0_i32_2 = arith.constant 0 : i32
    return %c0_i32, %c0_i32_0, %c0_i32_1 : i32, i32, i32
  }
  func.func @transform_5(%arg0: i32) -> (i32, i32, i32) {
    %c0_i32 = arith.constant 0 : i32
    %c0_i32_0 = arith.constant 0 : i32
    %c0_i32_1 = arith.constant 0 : i32
    %c0_i32_2 = arith.constant 0 : i32
    return %c0_i32, %c0_i32_0, %c0_i32_1 : i32, i32, i32
  }
  func.func @transform_6(%arg0: i32) -> (i32, i32, i32) {
    %c0_i32 = arith.constant 0 : i32
    %c0_i32_0 = arith.constant 0 : i32
    %c0_i32_1 = arith.constant 0 : i32
    %c0_i32_2 = arith.constant 0 : i32
    return %c0_i32, %c0_i32_0, %c0_i32_1 : i32, i32, i32
  }
  func.func @transform_7(%arg0: i32) -> (i32, i32, i32) {
    %c0_i32 = arith.constant 0 : i32
    %c0_i32_0 = arith.constant 0 : i32
    %c0_i32_1 = arith.constant 0 : i32
    %c0_i32_2 = arith.constant 0 : i32
    return %c0_i32, %c0_i32_0, %c0_i32_1 : i32, i32, i32
  }
  func.func @transform_8(%arg0: i32) -> (i32, i32, i32) {
    %c0_i32 = arith.constant 0 : i32
    %c0_i32_0 = arith.constant 0 : i32
    %c0_i32_1 = arith.constant 0 : i32
    %c0_i32_2 = arith.constant 0 : i32
    return %c0_i32, %c0_i32_0, %c0_i32_1 : i32, i32, i32
  }
  func.func @transform_9(%arg0: i32) -> (i32, i32, i32) {
    %c0_i32 = arith.constant 0 : i32
    %c0_i32_0 = arith.constant 0 : i32
    %c0_i32_1 = arith.constant 0 : i32
    %c0_i32_2 = arith.constant 0 : i32
    return %c0_i32, %c0_i32_0, %c0_i32_1 : i32, i32, i32
  }
  func.func @transform_10(%arg0: i32) -> (i32, i32) {
    %c0_i32 = arith.constant 0 : i32
    %c0_i32_0 = arith.constant 0 : i32
    %c0_i32_1 = arith.constant 0 : i32
    return %c0_i32, %c0_i32_0 : i32, i32
  }
  func.func @transform_11(%arg0: i32) -> (i32, i32) {
    %c0_i32 = arith.constant 0 : i32
    %c0_i32_0 = arith.constant 0 : i32
    %c0_i32_1 = arith.constant 0 : i32
    return %c0_i32, %c0_i32_0 : i32, i32
  }
  func.func @transform_12(%arg0: i32) -> (i32, i32) {
    %c0_i32 = arith.constant 0 : i32
    %c0_i32_0 = arith.constant 0 : i32
    %c0_i32_1 = arith.constant 0 : i32
    return %c0_i32, %c0_i32_0 : i32, i32
  }
  func.func @transform_13(%arg0: i32) -> (i32, i32) {
    %c0_i32 = arith.constant 0 : i32
    %c0_i32_0 = arith.constant 0 : i32
    %c0_i32_1 = arith.constant 0 : i32
    return %c0_i32, %c0_i32_0 : i32, i32
  }
  func.func @transform_14(%arg0: i32) -> (i32, i32) {
    %c0_i32 = arith.constant 0 : i32
    %c0_i32_0 = arith.constant 0 : i32
    %c0_i32_1 = arith.constant 0 : i32
    return %c0_i32, %c0_i32_0 : i32, i32
  }
  func.func @transform_15(%arg0: i32) -> (i32, i32) {
    %c0_i32 = arith.constant 0 : i32
    %c0_i32_0 = arith.constant 0 : i32
    %c0_i32_1 = arith.constant 0 : i32
    return %c0_i32, %c0_i32_0 : i32, i32
  }
  func.func @transform_16(%arg0: i32) -> (i32, i32) {
    %c0_i32 = arith.constant 0 : i32
    %c0_i32_0 = arith.constant 0 : i32
    %c0_i32_1 = arith.constant 0 : i32
    return %c0_i32, %c0_i32_0 : i32, i32
  }
  func.func @transform_17(%arg0: i32) -> (i32, i32) {
    %c0_i32 = arith.constant 0 : i32
    %c0_i32_0 = arith.constant 0 : i32
    %c0_i32_1 = arith.constant 0 : i32
    return %c0_i32, %c0_i32_0 : i32, i32
  }
  func.func @transform_18(%arg0: i32) -> (i32, i32, i32) {
    %c0_i32 = arith.constant 0 : i32
    %c0_i32_0 = arith.constant 0 : i32
    %c0_i32_1 = arith.constant 0 : i32
    return %arg0, %c0_i32, %c0_i32_0 : i32, i32, i32
  }
}

</mosaic_0001>

<bundles_post_ra>
// kernel: tpu_custom_call.1
= control target key start
LH: loop header
LB: loop body
LE: loop exit
PB: predicated region body
PF: predicated region fallthrough
CT: control target
= control target key end

     0   :  { %s3758_s0 = inlined_call_operand.vmem [shape: f32[2,8,32], index: 0, kind: input, shape index: {}]   ;;  %s3759_s1 = inlined_call_operand.vmem [shape: f32[8,8], index: 1, kind: input, shape index: {}]   ;;  %s3760_s2 = inlined_call_operand.vmem [shape: f32[1,32], index: 2, kind: input, shape index: {}]   ;;  %s3761_s3 = inlined_call_operand.vmem [shape: f32[1,32], index: 3, kind: input, shape index: {}]   ;;  %s3762_s4 = inlined_call_operand.vmem [shape: f32[4,32,8], index: 4, kind: input, shape index: {}]   ;;  %s3763_s5 = inlined_call_operand.vmem [shape: f32[4,1,8], index: 5, kind: input, shape index: {}]   ;;  %s3764_s6 = inlined_call_operand.vmem [shape: f32[4,8,32], index: 6, kind: input, shape index: {}]   ;;  %s3765_s7 = inlined_call_operand.vmem [shape: f32[4,8,1], index: 7, kind: input, shape index: {}]   ;;  %s3766_s8 = inlined_call_operand.vmem [shape: f32[4,32,8], index: 8, kind: input, shape index: {}]   ;;  %s3767_s9 = inlined_call_operand.vmem [shape: f32[4,1,8], index: 9, kind: input, shape index: {}]   ;;  %s3768_s10 = inlined_call_operand.vmem [shape: f32[32,32], index: 10, kind: input, shape index: {}]   ;;  %s3769_s11 = inlined_call_operand.vmem [shape: f32[1,32], index: 11, kind: input, shape index: {}]   ;;  %s3770_s12 = inlined_call_operand.vmem [shape: f32[1,32], index: 12, kind: input, shape index: {}]   ;;  %s3771_s13 = inlined_call_operand.vmem [shape: f32[1,32], index: 13, kind: input, shape index: {}]   ;;  %s3772_s14 = inlined_call_operand.vmem [shape: f32[32,128], index: 14, kind: input, shape index: {}]   ;;  %s3773_s15 = inlined_call_operand.vmem [shape: f32[1,128], index: 15, kind: input, shape index: {}]   ;;  %s3774_s16 = inlined_call_operand.vmem [shape: f32[128,32], index: 16, kind: input, shape index: {}]   ;;  %s3775_s17 = inlined_call_operand.vmem [shape: f32[1,32], index: 17, kind: input, shape index: {}]   ;;  %s3776_s18 = inlined_call_operand.hbm [shape: f32[2,8,32], index: 18, kind: output, shape index: {}]  }
   0x1   :  { %3778 = sst [smem:[#allocation7_spill]] %s3758_s0 }
   0x2   :  { %3779 = sst [smem:[#allocation8_spill]] %s3759_s1 }
   0x3   :  { %3780 = sst [smem:[#allocation9_spill]] %s3760_s2 }
   0x4   :  { %3781 = sst [smem:[#allocation10_spill]] %s3761_s3 }
   0x5   :  { %3782 = sst [smem:[#allocation11_spill]] %s3762_s4 }
   0x6   :  { %3783 = sst [smem:[#allocation12_spill]] %s3763_s5 }
   0x7   :  { %3784 = sst [smem:[#allocation13_spill]] %s3764_s6 }
   0x8   :  { %23 = vsyncpa [#allocation3], 0 }
   0x9   :  { %25 = vsyncpa [#allocation3 + $0x1], 0  ;;  %s3242_s27 = smov 0   ;;  %s3244_s28 = smov 0  }
   0xa   :  { %s3246_s29 = smov 0   ;;  %s3248_s30 = smov 0  }
   0xb LB: > { %3785 = sst [smem:[#allocation5_spill]] %s3134_s29  ;;  %s3263_s0 = sadd.s32 4294967295, %s3138_s30   ;;  %s3138_s30 = sphi %s3248_s30, %s3800_s30   ;;  %s3134_s29 = sphi %s3246_s29, %s3797_s29   ;;  %s3130_s28 = sphi %s3244_s28, %s3799_s28   ;;  %s3126_s27 = sphi %s3242_s27, %s3798_s27  }
   0xc   : > { %s2627_s19 = sadd.s32 4294967294, %s3138_s30   ;;  %s3267_s1 = sadd.s32 1, %s3138_s30  }
   0xd   : > { %s421_s20 = sadd.s32 1, %s3134_s29  ;;  %s418_s21 = ssub.s32 %s3138_s30, %s3267_s1 }
   0xe   : > { %p431_p0 = scmp.ne.s32.totalorder %s3134_s29, %s3130_s28  ;;  %p419_p1 = scmp.eq.s32.totalorder %s418_s21, 0 }
   0xf   : > { %p432_p2 = scmp.eq.s32.totalorder %s3263_s0, 1  ;;  %p437_p3 = scmp.ne.s32.totalorder %s3130_s28, %s3126_s27 }
  0x10   : > { %p438_p4 = scmp.eq.s32.totalorder %s2627_s19, 1  ;;  %p2630_p7 = scmp.ge.s32.totalorder %s3138_s30, 1 }
  0x11   : > { %s3278_s22 = scalar_select %p419_p1, %s3134_s29, %s421_s20  }
  0x12   : > { %p3280_p5 = por %p432_p2, %p431_p0  ;;  %p3284_p6 = por %p438_p4, %p437_p3 }
  0x13   : > { %3786 = sst [smem:[#allocation6_spill]] %s3278_s22  ;;  %p514_p8 = scmp.lt.s32.totalorder %s3138_s30, 3 }
  0x15   : > { %p515_p9 = pnand %p2630_p7, %p514_p8 }
  0x16   : > { %p567_p10 = scmp.lt.s32.totalorder (!%p515_p9), %s3263_s0, 1  ;;  %s3789_s20 = sld [smem:[#allocation7_spill]] (!%p515_p9) }
  0x17   : > { %518 = sbr.rel (%p515_p9) target bundleno = 2457 (0x999), region = 92  ;;  %s3790_s4 = sld [smem:[#allocation11_spill]] (!%p515_p9) }
  0x18   : > { %s3792_s3 = sld [smem:[#allocation10_spill]] (!%p515_p9)  ;;  %s3144_s19 = smov (!%p515_p9), 16  }
  0x19   : > { %s3793_s6 = sld [smem:[#allocation13_spill]] (!%p515_p9)  ;;  %s2672_s26 = sshll.u32 (!%p515_p9), %s3263_s0, 7 }
  0x1a   : > { %s3794_s5 = sld [smem:[#allocation12_spill]] (!%p515_p9) }
  0x1b   : > { %s3795_s22 = sld [smem:[#allocation8_spill]] (!%p515_p9) }
  0x1c   : > { %s568_s24 = scalar_select %p567_p10, %s3263_s0, 1  ;;  %vm574_vm0 = vcmask 261120   ;;  %v3140_v7 = vmov 0.0   ;;  %vm3141_vm1 = vmmov 0   ;;  %v966_v33 = vld [vmem:[%s3765_s7] sm:$0xff]  ;;  %v3142_v34 = vmov 0  }
  0x1d   : > { %2778 = vmatprep.subr.mxu1 %v3140_v7  ;;  %v638_v8 = vld [vmem:[%s3790_s4 + $0x18] sm:$0xff]  ;;  %2822 = vmatprep.subr.mxu0 %v3140_v7  ;;  %v637_v9 = vld [vmem:[%s3790_s4 + $0x10] sm:$0xff]  ;;  %v636_v10 = vld [vmem:[%s3790_s4 + $0x8] sm:$0xff]  ;;  %vm1607_vm2 = vcmask 64512   ;;  %vm2249_vm3 = vcmask 130048   ;;  %vm2251_vm4 = vcmask 195584  }
  0x1e   : > { %s2632_s25 = sshll.u32 %s568_s24, 3  ;;  %2779 = vmatpush3.msra.mxu1 %v638_v8  ;;  %v635_v11 = vld [vmem:[%s3790_s4] sm:$0xff]  ;;  %2786 = vmatprep.mubr.msk.f32.mxu1 %vm3141_vm1, %v3140_v7  ;;  %v642_v21 = vld [vmem:[%s3790_s4 + $0x38] sm:$0xff]  ;;  %v641_v22 = vld [vmem:[%s3790_s4 + $0x30] sm:$0xff]  ;;  %s3143_s24 = smov 8  }
  0x1f   : > { %s570_s21 = scalar_lea.vmem %s3789_s20, %s2632_s25  ;;  %2780 = vmatprep.subr.mxu1 %v3140_v7  ;;  %2830 = vmatprep.mubr.msk.f32.mxu0 %vm3141_vm1, %v3140_v7  ;;  %s3791_s20 = sld [smem:[#allocation9_spill]]  ;;  %v2634_v18 = vld [vmem:[%s3792_s3] ss:$0 sm:$0xff]  ;;  %v640_v23 = vld [vmem:[%s3790_s4 + $0x28] sm:$0xff]  ;;  %v646_v25 = vld [vmem:[%s3790_s4 + $0x58] sm:$0xff] }
  0x20   : > { %v3295_v0 = vld [vmem:[%s570_s21] sm:$0xff]  ;;  %2781 = vmatpush3.msra.mxu1 %v637_v9  ;;  %v645_v26 = vld [vmem:[%s3790_s4 + $0x50] sm:$0xff]  ;;  %v644_v27 = vld [vmem:[%s3790_s4 + $0x48] sm:$0xff]  ;;  %3053 = vset.pattern.permute.xlu0 %v3142_v34  ;;  %s3146_s0 = smov [#allocation2]  }
  0x21   : > { %v575_v1 = vsel %vm574_vm0, %v3295_v0, 0.0  ;;  %2782 = vmatprep.subr.mxu1 %v3140_v7  ;;  %v639_v24 = vld [vmem:[%s3790_s4 + $0x20] sm:$0xff]  ;;  %v650_v29 = vld [vmem:[%s3790_s4 + $0x78] sm:$0xff]  ;;  %v649_v30 = vld [vmem:[%s3790_s4 + $0x70] sm:$0xff] }
  0x22   : > { %576 = vadd.xlane.f32.xlu0 %v575_v1  ;;  %2783 = vmatpush3.msra.mxu1 %v636_v10  ;;  %v643_v28 = vld [vmem:[%s3790_s4 + $0x40] sm:$0xff]  ;;  %v648_v31 = vld [vmem:[%s3790_s4 + $0x68] sm:$0xff]  ;;  %v968_v36 = vld [vmem:[%s3765_s7 + $0x10] sm:$0xff] }
  0x23   : > { %2784 = vmatprep.subr.mxu1 %v3140_v7  ;;  %v647_v32 = vld [vmem:[%s3790_s4 + $0x60] sm:$0xff]  ;;  %v967_v35 = vld [vmem:[%s3765_s7 + $0x8] sm:$0xff]  ;;  %v969_v37 = vld [vmem:[%s3765_s7 + $0x18] sm:$0xff]  ;;  %s2566_s4 = scalar_lea.hbm %s3776_s18, %s2672_s26 }
  0x24   : > { %2785 = vmatpush3.msra.mxu1 %v635_v11  ;;  %v962_v42 = vld [vmem:[%s3793_s6] sm:$0xff]  ;;  %v963_v43 = vld [vmem:[%s3793_s6 + $0x8] sm:$0xff]  ;;  %v964_v44 = vld [vmem:[%s3793_s6 + $0x10] sm:$0xff] }
  0x25   : > { %2789 = vmatprep.subr.mxu1 %v3140_v7  ;;  %v2633_v16 = vld [vmem:[%s3791_s20] ss:$0 sm:$0xff]  ;;  %v965_v45 = vld [vmem:[%s3793_s6 + $0x18] sm:$0xff]  ;;  %v1284_v48 = vld [vmem:[%s3766_s8 + $0x10] sm:$0xff]  ;;  %s3145_s20 = smov 24  }
  0x26   : > { %v1285_v46 = vld [vmem:[%s3766_s8 + $0x18] sm:$0xff]  ;;  %v1288_v49 = vld [vmem:[%s3766_s8 + $0x30] sm:$0xff]  ;;  %v1283_v50 = vld [vmem:[%s3766_s8 + $0x8] sm:$0xff] }
  0x27   : > { %v1289_v47 = vld [vmem:[%s3766_s8 + $0x38] sm:$0xff]  ;;  %v1287_v51 = vld [vmem:[%s3766_s8 + $0x28] sm:$0xff]  ;;  %v1282_v52 = vld [vmem:[%s3766_s8] sm:$0xff] }
  0x28   : > { %v1286_v53 = vld [vmem:[%s3766_s8 + $0x20] sm:$0xff]  ;;  %v1293_v54 = vld [vmem:[%s3766_s8 + $0x58] sm:$0xff]  ;;  %v1292_v56 = vld [vmem:[%s3766_s8 + $0x50] sm:$0xff] }
  0x29   : > { %v1297_v55 = vld [vmem:[%s3766_s8 + $0x78] sm:$0xff]  ;;  %v1296_v57 = vld [vmem:[%s3766_s8 + $0x70] sm:$0xff]  ;;  %v1291_v58 = vld [vmem:[%s3766_s8 + $0x48] sm:$0xff] }
  0x2a   : > { %v1295_v59 = vld [vmem:[%s3766_s8 + $0x68] sm:$0xff]  ;;  %v1290_v60 = vld [vmem:[%s3766_s8 + $0x40] sm:$0xff] }
  0x2b   : > { %v1294_v61 = vld [vmem:[%s3766_s8 + $0x60] sm:$0xff] }
  0x2c   : > { %v2635_v10 = vld [vmem:[%s3794_s5] ss:$0 sm:$0xff]  ;;  %v2636_v11 = vld [vmem:[%s3794_s5 + $0x1] ss:$0 sm:$0xff] }
  0xab   : > { %v577_v2 = vpop.xlane.xlu0 %576 }
  0xac   : > { %v579_v3 = vmul.f32 0.03125, %v577_v2 }
  0xae   : > { %v580_v4 = vsub.f32 %v3295_v0, %v579_v3 }
  0xb0   : > { %v581_v5 = vmul.f32 %v580_v4, %v580_v4 }
  0xb2   : > { %v582_v6 = vsel %vm574_vm0, %v581_v5, 0.0 }
  0xb3   : > { %583 = vadd.xlane.f32.xlu0 %v582_v6 }
  0xc9   : > { %977 = vperm.xlu0 %3053, %v967_v35  }
 0x13c   : > { %v584_v12 = vpop.xlane.xlu0 %583 }
 0x13d   : > { %v585_v13 = vmul.f32 0.03125, %v584_v12 }
 0x13f   : > { %v586_v14 = vadd.f32 1e-05, %v585_v13 }
 0x141   : > { %3054 = vrsqrt.f32 %v586_v14 }
 0x144   : > { %v978_v9 = vpop.permute.xlu0 %977 }
 0x14e   : > { %v3055_v15 = vpop.eup %3054 }
 0x14f   : > { %v588_v17 = vmul.f32 %v3055_v15, %v580_v4 }
 0x151   : > { %v595_v19 = vmul.f32 %v2633_v16, %v588_v17 }
 0x153   : > { %v3329_v20 = vadd.f32 %v2634_v18, %v595_v19 }
 0x155   : > { %603 = vxpose.xlu1.b32.start.end [1/1] (short) (narrow) %v3329_v20, 32  ;;  %2787 = vmatmul.mubr.msk.f32.vlgmr.msra.gmra.mxu1 %vm574_vm0, %v3329_v20 }
 0x156   : > { %2790 = vmatpush3.msra.mxu1 %v642_v21  ;;  %2797 = vmatprep.mubr.msk.f32.mxu1 %vm3141_vm1, %v3140_v7  ;;  %v2637_v21 = vld [vmem:[%s3794_s5 + $0x2] ss:$0 sm:$0xff] }
 0x157   : > { %2791 = vmatprep.subr.mxu1 %v3140_v7 }
 0x158   : > { %2792 = vmatpush3.msra.mxu1 %v641_v22  ;;  %v2638_v22 = vld [vmem:[%s3794_s5 + $0x3] ss:$0 sm:$0xff] }
 0x159   : > { %2793 = vmatprep.subr.mxu1 %v3140_v7 }
 0x15a   : > { %2794 = vmatpush3.msra.mxu1 %v640_v23 }
 0x15b   : > { %2795 = vmatprep.subr.mxu1 %v3140_v7 }
 0x15c   : > { %2796 = vmatpush3.msra.mxu1 %v639_v24 }
 0x15d   : > { %2798 = vmatmul.mubr.msk.f32.vlgmr.msra.gmra.mxu1 %vm574_vm0, %v3329_v20  ;;  %2800 = vmatprep.subr.mxu1 %v3140_v7 }
 0x15e   : > { %2801 = vmatpush3.msra.mxu1 %v646_v25  ;;  %2808 = vmatprep.mubr.msk.f32.mxu1 %vm3141_vm1, %v3140_v7 }
 0x15f   : > { %2802 = vmatprep.subr.mxu1 %v3140_v7 }
 0x160   : > { %2803 = vmatpush3.msra.mxu1 %v645_v26 }
 0x161   : > { %2804 = vmatprep.subr.mxu1 %v3140_v7 }
 0x162   : > { %2805 = vmatpush3.msra.mxu1 %v644_v27 }
 0x163   : > { %2806 = vmatprep.subr.mxu1 %v3140_v7 }
 0x164   : > { %2807 = vmatpush3.msra.mxu1 %v643_v28 }
 0x165   : > { %2809 = vmatmul.mubr.msk.f32.vlgmr.msra.gmra.mxu1 %vm574_vm0, %v3329_v20  ;;  %2811 = vmatprep.subr.mxu1 %v3140_v7 }
 0x166   : > { %2812 = vmatpush3.msra.mxu1 %v650_v29  ;;  %2819 = vmatprep.mubr.msk.f32.mxu1 %vm3141_vm1, %v3140_v7 }
 0x167   : > { %2813 = vmatprep.subr.mxu1 %v3140_v7 }
 0x168   : > { %2814 = vmatpush3.msra.mxu1 %v649_v30 }
 0x169   : > { %2815 = vmatprep.subr.mxu1 %v3140_v7 }
 0x16a   : > { %2816 = vmatpush3.msra.mxu1 %v648_v31 }
 0x16b   : > { %2817 = vmatprep.subr.mxu1 %v3140_v7 }
 0x16c   : > { %2818 = vmatpush3.msra.mxu1 %v647_v32  ;;  %v2647_v32 = vld [vmem:[%s3767_s9] ss:$0 sm:$0xff] }
 0x16d   : > { %2820 = vmatmul.mubr.msk.f32.vlgmr.msra.gmra.mxu1 %vm574_vm0, %v3329_v20  ;;  %2833 = vmatprep.subr.mxu1 %v3140_v7 }
 0x16e   : > { %2841 = vmatprep.mubr.msk.f32.mxu1 %vm3141_vm1, %v3140_v7 }
 0x173   : > { %3052 = vset.pattern.permute.xlu1 %v3142_v34 }
 0x17f   : > { %972 = vperm.xlu1 %3052, %v966_v33   ;;  %v2648_v33 = vld [vmem:[%s3767_s9 + $0x1] ss:$0 sm:$0xff] }
 0x183   : > { %982 = vperm.xlu1 %3052, %v968_v36  }
 0x187   : > { %987 = vperm.xlu1 %3052, %v969_v37  }
 0x1d1   : > { %v619_v38 = vpop.trf.xlu1 }
 0x1d5   : > { %v620_v39 = vpop.trf.xlu1 }
 0x1d9   : > { %v621_v40 = vpop.trf.xlu1 }
 0x1dd   : > { %v622_v41 = vpop.trf.xlu1 }
 0x1de   : > { %2823 = vmatpush3.msra.mxu0 %v622_v41  ;;  %2834 = vmatpush3.msra.mxu1 %v622_v41 }
 0x1df   : > { %2824 = vmatprep.subr.mxu0 %v3140_v7  ;;  %2835 = vmatprep.subr.mxu1 %v3140_v7 }
 0x1e0   : > { %2825 = vmatpush3.msra.mxu0 %v621_v40  ;;  %2836 = vmatpush3.msra.mxu1 %v621_v40 }
 0x1e1   : > { %2826 = vmatprep.subr.mxu0 %v3140_v7  ;;  %2837 = vmatprep.subr.mxu1 %v3140_v7 }
 0x1e2   : > { %2827 = vmatpush3.msra.mxu0 %v620_v39  ;;  %2838 = vmatpush3.msra.mxu1 %v620_v39 }
 0x1e3   : > { %2828 = vmatprep.subr.mxu0 %v3140_v7  ;;  %2839 = vmatprep.subr.mxu1 %v3140_v7 }
 0x1e4   : > { %2829 = vmatpush3.msra.mxu0 %v619_v38  ;;  %2840 = vmatpush3.msra.mxu1 %v619_v38 }
 0x1e5   : > { %2831 = vmatmul.mubr.msk.f32.vlgmr.msra.gmra.mxu0 %vm574_vm0, %v962_v42  ;;  %2842 = vmatmul.mubr.msk.f32.vlgmr.msra.gmra.mxu1 %vm574_vm0, %v963_v43 }
 0x1e6   : > { %2844 = vmatprep.subr.mxu0 %v3140_v7  ;;  %2855 = vmatprep.subr.mxu1 %v3140_v7 }
 0x1e7   : > { %2845 = vmatpush3.msra.mxu0 %v622_v41  ;;  %2856 = vmatpush3.msra.mxu1 %v622_v41 }
 0x1e8   : > { %2846 = vmatprep.subr.mxu0 %v3140_v7  ;;  %2857 = vmatprep.subr.mxu1 %v3140_v7 }
 0x1e9   : > { %2847 = vmatpush3.msra.mxu0 %v621_v40  ;;  %2858 = vmatpush3.msra.mxu1 %v621_v40 }
 0x1ea   : > { %2848 = vmatprep.subr.mxu0 %v3140_v7  ;;  %2859 = vmatprep.subr.mxu1 %v3140_v7 }
 0x1eb   : > { %2849 = vmatpush3.msra.mxu0 %v620_v39  ;;  %2860 = vmatpush3.msra.mxu1 %v620_v39 }
 0x1ec   : > { %2850 = vmatprep.subr.mxu0 %v3140_v7  ;;  %2861 = vmatprep.subr.mxu1 %v3140_v7 }
 0x1ed   : > { %2851 = vmatpush3.msra.mxu0 %v619_v38  ;;  %2852 = vmatprep.mubr.msk.f32.mxu0 %vm3141_vm1, %v3140_v7 }
 0x1ee   : > { %2862 = vmatpush3.msra.mxu1 %v619_v38  ;;  %2863 = vmatprep.mubr.msk.f32.mxu1 %vm3141_vm1, %v3140_v7 }
 0x1ef   : > { %2853 = vmatmul.mubr.msk.f32.vlgmr.msra.gmra.mxu0 %vm574_vm0, %v964_v44  ;;  %2864 = vmatmul.mubr.msk.f32.vlgmr.msra.gmra.mxu1 %vm574_vm0, %v965_v45  ;;  %v1606_v44 = vld [vmem:[%s3795_s22] sm:$0xff]  ;;  %s564_s22 = sand.u32 1, %s3130_s28  }
 0x1f0   : > { %2866 = vmatprep.subr.mxu0 %v3140_v7  ;;  %2877 = vmatprep.subr.mxu1 %v3140_v7  ;;  %s2631_s21 = sshll.u32 %s564_s22, 3  ;;  %s2555_s5 = scalar_lea.sflag [#allocation3], %s564_s22 }
 0x1f1   : > { %2867 = vmatpush3.msra.mxu0 %v1285_v46  ;;  %2878 = vmatpush3.msra.mxu1 %v1289_v47  ;;  %s566_s25 = scalar_lea.vmem [#allocation2], %s2631_s21  ;;  %s3082_s21 = sshll.u32 %s3146_s0, 4  ;;  %s3083_s21 = int_to_ptr.vmem [resolvable:$false] %s3082_s21 }
 0x1f2   : > { %2868 = vmatprep.subr.mxu0 %v3140_v7  ;;  %2879 = vmatprep.subr.mxu1 %v3140_v7  ;;  %s3084_s29 = scalar_lea.vmem %s3083_s21, 256 }
 0x1f3   : > { %2869 = vmatpush3.msra.mxu0 %v1284_v48  ;;  %2880 = vmatpush3.msra.mxu1 %v1288_v49 }
 0x1f4   : > { %2870 = vmatprep.subr.mxu0 %v3140_v7  ;;  %2881 = vmatprep.subr.mxu1 %v3140_v7 }
 0x1f5   : > { %2871 = vmatpush3.msra.mxu0 %v1283_v50  ;;  %2882 = vmatpush3.msra.mxu1 %v1287_v51 }
 0x1f6   : > { %2872 = vmatprep.subr.mxu0 %v3140_v7  ;;  %2883 = vmatprep.subr.mxu1 %v3140_v7 }
 0x1f7   : > { %2873 = vmatpush3.msra.mxu0 %v1282_v52  ;;  %2874 = vmatprep.mubr.msk.f32.mxu0 %vm3141_vm1, %v3140_v7 }
 0x1f8   : > { %2884 = vmatpush3.msra.mxu1 %v1286_v53  ;;  %2885 = vmatprep.mubr.msk.f32.mxu1 %vm3141_vm1, %v3140_v7 }
 0x1f9   : > { %2875 = vmatmul.mubr.msk.f32.vlgmr.msra.gmra.mxu0 %vm574_vm0, %v3329_v20  ;;  %2886 = vmatmul.mubr.msk.f32.vlgmr.msra.gmra.mxu1 %vm574_vm0, %v3329_v20 }
 0x1fa   : > { %2888 = vmatprep.subr.mxu0 %v3140_v7  ;;  %2899 = vmatprep.subr.mxu1 %v3140_v7  ;;  %v973_v8 = vpop.permute.xlu1 %972 }
 0x1fb   : > { %2889 = vmatpush3.msra.mxu0 %v1293_v54  ;;  %2900 = vmatpush3.msra.mxu1 %v1297_v55 }
 0x1fc   : > { %2890 = vmatprep.subr.mxu0 %v3140_v7  ;;  %2901 = vmatprep.subr.mxu1 %v3140_v7 }
 0x1fd   : > { %2891 = vmatpush3.msra.mxu0 %v1292_v56  ;;  %2902 = vmatpush3.msra.mxu1 %v1296_v57 }
 0x1fe   : > { %2892 = vmatprep.subr.mxu0 %v3140_v7  ;;  %2903 = vmatprep.subr.mxu1 %v3140_v7 }
 0x1ff   : > { %2893 = vmatpush3.msra.mxu0 %v1291_v58  ;;  %2904 = vmatpush3.msra.mxu1 %v1295_v59 }
 0x200   : > { %2894 = vmatprep.subr.mxu0 %v3140_v7  ;;  %2905 = vmatprep.subr.mxu1 %v3140_v7 }
 0x201   : > { %2895 = vmatpush3.msra.mxu0 %v1290_v60  ;;  %2896 = vmatprep.mubr.msk.f32.mxu0 %vm3141_vm1, %v3140_v7 }
 0x202   : > { %2906 = vmatpush3.msra.mxu1 %v1294_v61  ;;  %2907 = vmatprep.mubr.msk.f32.mxu1 %vm3141_vm1, %v3140_v7 }
 0x203   : > { %2897 = vmatmul.mubr.msk.f32.vlgmr.msra.gmra.mxu0 %vm574_vm0, %v3329_v20  ;;  %2908 = vmatmul.mubr.msk.f32.vlgmr.msra.gmra.mxu1 %vm574_vm0, %v3329_v20  ;;  %v983_v20 = vpop.permute.xlu1 %982 }
 0x204   : > { %2910 = vmatprep.subr.mxu0 %v3140_v7  ;;  %2915 = vmatprep.subr.mxu1 %v3140_v7 }
 0x205   : > { %2912 = vmatprep.mubr.msk.f32.mxu0 %vm3141_vm1, %v3140_v7  ;;  %2917 = vmatprep.mubr.msk.f32.mxu1 %vm3141_vm1, %v3140_v7 }
 0x207   : > { %v988_v23 = vpop.permute.xlu1 %987 }
 0x215   : > { %v748_v62 = vpop.f32.mrf.mxu1 }
 0x216   : > { %v749_v16 = vadd.f32 %v2635_v10, %v748_v62 }
 0x217   : > { %v2788_v63 = vpop.f32.mrf.mxu1 }
 0x21d   : > { %v818_v1 = vpop.f32.mrf.mxu1 }
 0x21e   : > { %v819_v17 = vadd.f32 %v2636_v11, %v818_v1 }
 0x21f   : > { %v2799_v2 = vpop.f32.mrf.mxu1 }
 0x225   : > { %v888_v3 = vpop.f32.mrf.mxu1 }
 0x226   : > { %v889_v28 = vadd.f32 %v2637_v21, %v888_v3 }
 0x227   : > { %v2810_v4 = vpop.f32.mrf.mxu1 }
 0x22d   : > { %v958_v5 = vpop.f32.mrf.mxu1 }
 0x22e   : > { %v959_v29 = vadd.f32 %v2638_v22, %v958_v5  ;;  %v2650_v22 = vld [vmem:[%s3767_s9 + $0x3] ss:$0 sm:$0xff] }
 0x22f   : > { %v2821_v6 = vpop.f32.mrf.mxu1 }
 0x2a5   : > { %v1059_v12 = vpop.f32.mrf.mxu0  ;;  %v1132_v13 = vpop.f32.mrf.mxu1 }
 0x2a6   : > { %v1060_v14 = vadd.f32 %v1059_v12, %v973_v8  ;;  %v1133_v15 = vadd.f32 %v1132_v13, %v978_v9 }
 0x2a7   : > { %v2832_v18 = vpop.f32.mrf.mxu0  ;;  %v2843_v19 = vpop.f32.mrf.mxu1 }
 0x2a8   : > { %2911 = vmatpush3.msra.mxu0 %v1060_v14  ;;  %2916 = vmatpush3.msra.mxu1 %v1133_v15 }
 0x2a9   : > { %2913 = vmatmul.mubr.msk.f32.vlgmr.msra.gmra.mxu0 %vm1607_vm2, %v749_v16  ;;  %2918 = vmatmul.mubr.msk.f32.vlgmr.msra.gmra.mxu1 %vm1607_vm2, %v819_v17 }
 0x2aa   : > { %2920 = vmatprep.subr.mxu0 %v3140_v7  ;;  %2925 = vmatprep.subr.mxu1 %v3140_v7 }
 0x2ab   : > { %2922 = vmatprep.mubr.msk.f32.mxu0 %vm3141_vm1, %v3140_v7  ;;  %2927 = vmatprep.mubr.msk.f32.mxu1 %vm3141_vm1, %v3140_v7 }
 0x2af   : > { %v1205_v24 = vpop.f32.mrf.mxu0  ;;  %v1278_v25 = vpop.f32.mrf.mxu1 }
 0x2b0   : > { %v1206_v26 = vadd.f32 %v1205_v24, %v983_v20  ;;  %v1279_v27 = vadd.f32 %v1278_v25, %v988_v23  ;;  %v2649_v24 = vld [vmem:[%s3767_s9 + $0x2] ss:$0 sm:$0xff] }
 0x2b1   : > { %v2854_v30 = vpop.f32.mrf.mxu0  ;;  %v2865_v31 = vpop.f32.mrf.mxu1 }
 0x2b2   : > { %2921 = vmatpush3.msra.mxu0 %v1206_v26  ;;  %2926 = vmatpush3.msra.mxu1 %v1279_v27 }
 0x2b3   : > { %2923 = vmatmul.mubr.msk.f32.vlgmr.msra.gmra.mxu0 %vm1607_vm2, %v889_v28  ;;  %2928 = vmatmul.mubr.msk.f32.vlgmr.msra.gmra.mxu1 %vm1607_vm2, %v959_v29 }
 0x2b4   : > { %2930 = vmatprep.subr.mxu0 %v3140_v7  ;;  %2935 = vmatprep.subr.mxu1 %v3140_v7 }
 0x2b5   : > { %2932 = vmatprep.mubr.msk.f32.mxu0 %vm3141_vm1, %v3140_v7  ;;  %2937 = vmatprep.mubr.msk.f32.mxu1 %vm3141_vm1, %v3140_v7 }
 0x2b9   : > { %v1392_v34 = vpop.f32.mrf.mxu0  ;;  %v1462_v35 = vpop.f32.mrf.mxu1 }
 0x2ba   : > { %v1393_v36 = vadd.f32 %v2647_v32, %v1392_v34  ;;  %v1463_v37 = vadd.f32 %v2648_v33, %v1462_v35  ;;  %v2256_v35 = vld [vmem:[%s3768_s10 + $0x18] sm:$0xff] }
 0x2bb   : > { %v2876_v38 = vpop.f32.mrf.mxu0  ;;  %v2887_v39 = vpop.f32.mrf.mxu1 }
 0x2bc   : > { %2931 = vmatpush3.msra.mxu0 %v1393_v36  ;;  %2936 = vmatpush3.msra.mxu1 %v1463_v37  ;;  %v2255_v36 = vld [vmem:[%s3768_s10 + $0x10] sm:$0xff]  ;;  %v2254_v37 = vld [vmem:[%s3768_s10 + $0x8] sm:$0xff] }
 0x2bd   : > { %2940 = vmatprep.subr.mxu0 %v3140_v7  ;;  %2945 = vmatprep.subr.mxu1 %v3140_v7 }
 0x2c3   : > { %v3564_v40 = vpop.f32.mrf.mxu0  ;;  %v3566_v41 = vpop.f32.mrf.mxu1 }
 0x2c4   : > { %v1603_v28 = vadd.f32 %v2650_v22, %v3566_v41  ;;  %v1533_v30 = vadd.f32 %v2649_v24, %v3564_v40  ;;  %v2253_v41 = vld [vmem:[%s3768_s10] sm:$0xff]  ;;  %v2466_v22 = vld [vmem:[%s3774_s16 + $0x38] sm:$0xff]  ;;  %v2464_v24 = vld [vmem:[%s3774_s16 + $0x28] sm:$0xff] }
 0x2c5   : > { %v2898_v42 = vpop.f32.mrf.mxu0  ;;  %v2909_v43 = vpop.f32.mrf.mxu1 }
 0x369   : > { %v1677_v45 = vpop.f32.mrf.mxu0  ;;  %v1750_v46 = vpop.f32.mrf.mxu1 }
 0x36a   : > { %v1678_v47 = vadd.f32 %v1677_v45, %v1606_v44  ;;  %v1751_v48 = vadd.f32 %v1750_v46, %v1606_v44 }
 0x36b   : > { %v2914_v49 = vpop.f32.mrf.mxu0  ;;  %v2919_v50 = vpop.f32.mrf.mxu1 }
 0x36c   : > { %v1900_v51 = vsel %vm1607_vm2, %v1678_v47, -inf  ;;  %v1903_v52 = vsel %vm1607_vm2, %v1751_v48, -inf }
 0x36d   : > { %1901 = vmax.xlane.f32.xlu0 %v1900_v51  ;;  %1904 = vmax.xlane.f32.xlu1 %v1903_v52 }
 0x373   : > { %v1823_v53 = vpop.f32.mrf.mxu0  ;;  %v1896_v54 = vpop.f32.mrf.mxu1 }
 0x374   : > { %v1824_v55 = vadd.f32 %v1823_v53, %v1606_v44  ;;  %v1897_v58 = vadd.f32 %v1896_v54, %v1606_v44  ;;  %v2663_v53 = vld [vmem:[%s3769_s11] ss:$0 sm:$0xff] }
 0x375   : > { %v2924_v56 = vpop.f32.mrf.mxu0  ;;  %v2929_v57 = vpop.f32.mrf.mxu1 }
 0x376   : > { %v1906_v59 = vsel %vm1607_vm2, %v1824_v55, -inf  ;;  %v1909_v60 = vsel %vm1607_vm2, %v1897_v58, -inf }
 0x377   : > { %1907 = vmax.xlane.f32.xlu0 %v1906_v59 }
 0x37b   : > { %1910 = vmax.xlane.f32.xlu0 %v1909_v60 }
 0x3f6   : > { %v1905_v61 = vpop.xlane.xlu1 %1904  ;;  %v1902_v62 = vpop.xlane.xlu0 %1901 }
 0x3f7   : > { %v1913_v63 = vsub.f32 %v1751_v48, %v1905_v61  ;;  %v1912_v1 = vsub.f32 %v1678_v47, %v1902_v62 }
 0x3f9   : > { %v1918_v2 = vmul.f32 1.442695, %v1913_v63  ;;  %v1916_v3 = vmul.f32 1.442695, %v1912_v1  ;;  %v2370_v1 = vld [vmem:[%s3772_s14 + $0x18] sm:$0xff] }
 0x3fb   : > { %3056 = vpow2.f32 %v1918_v2  ;;  %v2368_v2 = vld [vmem:[%s3772_s14 + $0x8] sm:$0xff] }
 0x3fc   : > { %3058 = vpow2.f32 %v1916_v3  ;;  %v2367_v3 = vld [vmem:[%s3772_s14] sm:$0xff] }
 0x400   : > { %v1908_v4 = vpop.xlane.xlu0 %1907 }
 0x401   : > { %v1914_v5 = vsub.f32 %v1824_v55, %v1908_v4 }
 0x403   : > { %v1920_v6 = vmul.f32 1.442695, %v1914_v5 }
 0x404   : > { %v1911_v8 = vpop.xlane.xlu0 %1910 }
 0x405   : > { %3060 = vpow2.f32 %v1920_v6  ;;  %v1915_v9 = vsub.f32 %v1897_v58, %v1911_v8 }
 0x407   : > { %v1922_v10 = vmul.f32 1.442695, %v1915_v9  ;;  %v2665_v9 = vld [vmem:[%s3770_s12] ss:$0 sm:$0xff] }
 0x408   : > { %v3057_v11 = vpop.eup %3056 }
 0x409   : > { %v3059_v12 = vpop.eup %3058  ;;  %3062 = vpow2.f32 %v1922_v10  ;;  %v1927_v13 = vsel %vm1607_vm2, %v3057_v11, 0.0 }
 0x40a   : > { %1928 = vadd.xlane.f32.xlu0 %v1927_v13  ;;  %v1924_v14 = vsel %vm1607_vm2, %v3059_v12, 0.0 }
 0x40b   : > { %1925 = vadd.xlane.f32.xlu1 %v1924_v14  ;;  %v2474_v14 = vld [vmem:[%s3774_s16 + $0x78] sm:$0xff] }
 0x412   : > { %v3061_v15 = vpop.eup %3060 }
 0x413   : > { %v1930_v16 = vsel %vm1607_vm2, %v3061_v15, 0.0 }
 0x414   : > { %1931 = vadd.xlane.f32.xlu1 %v1930_v16  ;;  %v2472_v16 = vld [vmem:[%s3774_s16 + $0x68] sm:$0xff] }
 0x416   : > { %v3063_v17 = vpop.eup %3062 }
 0x417   : > { %v1933_v18 = vsel %vm1607_vm2, %v3063_v17, 0.0 }
 0x418   : > { %1934 = vadd.xlane.f32.xlu0 %v1933_v18  ;;  %v2470_v18 = vld [vmem:[%s3774_s16 + $0x58] sm:$0xff] }
 0x493   : > { %v1929_v19 = vpop.xlane.xlu0 %1928 }
 0x494   : > { %v1926_v20 = vpop.xlane.xlu1 %1925  ;;  %3064 = vrcp.f32 %v1929_v19  ;;  %v2469_v19 = vld [vmem:[%s3774_s16 + $0x50] sm:$0xff] }
 0x495   : > { %3066 = vrcp.f32 %v1926_v20  ;;  %v2468_v20 = vld [vmem:[%s3774_s16 + $0x48] sm:$0xff] }
 0x49d   : > { %v1932_v21 = vpop.xlane.xlu1 %1931 }
 0x49e   : > { %3068 = vrcp.f32 %v1932_v21  ;;  %v2467_v21 = vld [vmem:[%s3774_s16 + $0x40] sm:$0xff] }
 0x4a1   : > { %v3065_v23 = vpop.eup %3064  ;;  %v1935_v25 = vpop.xlane.xlu0 %1934 }
 0x4a2   : > { %v3067_v26 = vpop.eup %3066  ;;  %3070 = vrcp.f32 %v1935_v25  ;;  %v1941_v27 = vmul.f32 %v3065_v23, %v3057_v11  ;;  %v2666_v11 = vld [vmem:[%s3771_s13] ss:$0 sm:$0xff]  ;;  %v2465_v23 = vld [vmem:[%s3774_s16 + $0x30] sm:$0xff] }
 0x4a3   : > { %v1940_v29 = vmul.f32 %v3067_v26, %v3059_v12  ;;  %v2463_v25 = vld [vmem:[%s3774_s16 + $0x20] sm:$0xff]  ;;  %v2462_v26 = vld [vmem:[%s3774_s16 + $0x18] sm:$0xff] }
 0x4a4   : > { %2938 = vmatmul.mubr.msk.f32.vlgmr.msra.gmra.mxu1 %vm1607_vm2, %v1941_v27  ;;  %v2461_v27 = vld [vmem:[%s3774_s16 + $0x10] sm:$0xff] }
 0x4a5   : > { %2933 = vmatmul.mubr.msk.f32.vlgmr.msra.gmra.mxu0 %vm1607_vm2, %v1940_v29  ;;  %2946 = vmatpush3.msra.mxu1 %v1603_v28  ;;  %v2460_v28 = vld [vmem:[%s3774_s16 + $0x8] sm:$0xff]  ;;  %v2459_v29 = vld [vmem:[%s3774_s16] sm:$0xff] }
 0x4a6   : > { %2941 = vmatpush3.msra.mxu0 %v1533_v30  ;;  %2942 = vmatprep.mubr.msk.f32.mxu0 %vm3141_vm1, %v3140_v7  ;;  %v2667_v30 = vld [vmem:[%s3773_s15] ss:$0 sm:$0xff] }
 0x4a7   : > { %2947 = vmatprep.mubr.msk.f32.mxu1 %vm3141_vm1, %v3140_v7  ;;  %2950 = vmatprep.subr.mxu0 %v3140_v7 }
 0x4a8   : > { %2961 = vmatprep.subr.mxu1 %v3140_v7 }
 0x4ab   : > { %v3069_v31 = vpop.eup %3068 }
 0x4ac   : > { %v1942_v32 = vmul.f32 %v3069_v31, %v3061_v15  ;;  %v2473_v15 = vld [vmem:[%s3774_s16 + $0x70] sm:$0xff] }
 0x4ae   : > { %2943 = vmatmul.mubr.msk.f32.vlgmr.msra.gmra.mxu0 %vm1607_vm2, %v1942_v32 }
 0x4af   : > { %v3071_v33 = vpop.eup %3070  ;;  %2958 = vmatprep.mubr.msk.f32.mxu0 %vm3141_vm1, %v3140_v7  ;;  %2951 = vmatpush3.msra.mxu0 %v2256_v35 }
 0x4b0   : > { %v1943_v34 = vmul.f32 %v3071_v33, %v3063_v17  ;;  %2952 = vmatprep.subr.mxu0 %v3140_v7  ;;  %v2471_v17 = vld [vmem:[%s3774_s16 + $0x60] sm:$0xff] }
 0x4b1   : > { %2953 = vmatpush3.msra.mxu0 %v2255_v36 }
 0x4b2   : > { %2948 = vmatmul.mubr.msk.f32.vlgmr.msra.gmra.mxu1 %vm1607_vm2, %v1943_v34  ;;  %2954 = vmatprep.subr.mxu0 %v3140_v7 }
 0x4b3   : > { %2969 = vmatprep.mubr.msk.f32.mxu1 %vm3141_vm1, %v3140_v7  ;;  %2955 = vmatpush3.msra.mxu0 %v2254_v37 }
 0x4b4   : > { %2956 = vmatprep.subr.mxu0 %v3140_v7  ;;  %2962 = vmatpush3.msra.mxu1 %v2370_v1 }
 0x4b5   : > { %2957 = vmatpush3.msra.mxu0 %v2253_v41  ;;  %2963 = vmatprep.subr.mxu1 %v3140_v7 }
 0x4b6   : > { %2972 = vmatprep.subr.mxu0 %v3140_v7 }
 0x564   : > { %v2086_v38 = vpop.f32.mrf.mxu1 }
 0x565   : > { %v2013_v39 = vpop.f32.mrf.mxu0  ;;  %2237 = vrot.lane.b32.xlu1 %v2086_v38, %s3143_s24 }
 0x566   : > { %v2939_v40 = vpop.f32.mrf.mxu1 }
 0x567   : > { %v2934_v42 = vpop.f32.mrf.mxu0 }
 0x56e   : > { %v2159_v43 = vpop.f32.mrf.mxu0 }
 0x56f   : > { %2241 = vrot.lane.b32.xlu0 %v2159_v43, %s3144_s19  ;;  %s2568_s19 = sshll.u32 %s566_s25, 4  ;;  %s2569_s19 = int_to_ptr.vmem [resolvable:$true] %s2568_s19 }
 0x570   : > { %v2944_v44 = vpop.f32.mrf.mxu0  ;;  %s3078_s6 = scalar_lea.vmem %s2569_s19, 128  ;;  %p3085_p0 = scmp.lt.s32.totalorder %s2569_s19, %s3083_s21 }
 0x571   : > { %p3079_p11 = scmp.ne.s32.totalorder %s2569_s19, %s3078_s6  ;;  %p3086_p1 = scmp.lt.s32.totalorder %s3084_s29, %s3078_s6 }
 0x572   : > { %v2232_v45 = vpop.f32.mrf.mxu1 }
 0x573   : > { %2245 = vrot.lane.b32.xlu1 %v2232_v45, %s3145_s20  ;;  %p3080_p12 = pnand %p3079_p11, %p3280_p5  ;;  %p3087_p2 = por %p3086_p1, %p3085_p0 }
 0x574   : > { %v2949_v46 = vpop.f32.mrf.mxu1 }
 0x575   : > { %p3081_p13 = pneg %p3080_p12 }
 0x577   : > { %p3088_p3 = pnand %p3087_p2, %p3081_p13 }
 0x5d7   : > { %v2238_v47 = vpop.permute.xlu1 %2237 }
 0x5d8   : > { %v2248_v49 = vsel %vm1607_vm2, %v2013_v39, %v2238_v47 }
 0x5e1   : > { %v2242_v48 = vpop.permute.xlu0 %2241 }
 0x5e2   : > { %v2250_v50 = vsel %vm2249_vm3, %v2248_v49, %v2242_v48 }
 0x5e5   : > { %v2246_v51 = vpop.permute.xlu1 %2245 }
 0x5e6   : > { %v2252_v52 = vsel %vm2251_vm4, %v2250_v50, %v2246_v51 }
 0x5e7   : > { %2959 = vmatmul.mubr.msk.f32.vlgmr.msra.gmra.mxu0 %vm574_vm0, %v2252_v52 }
 0x5e8   : > { %3004 = vmatprep.mubr.msk.f32.mxu0 %vm3141_vm1, %v3140_v7  ;;  %2973 = vmatpush3.msra.mxu0 %v2474_v14 }
 0x5e9   : > { %2974 = vmatprep.subr.mxu0 %v3140_v7 }
 0x5ea   : > { %2975 = vmatpush3.msra.mxu0 %v2473_v15 }
 0x5eb   : > { %2976 = vmatprep.subr.mxu0 %v3140_v7 }
 0x5ec   : > { %2977 = vmatpush3.msra.mxu0 %v2472_v16 }
 0x5ed   : > { %2978 = vmatprep.subr.mxu0 %v3140_v7 }
 0x5ee   : > { %2979 = vmatpush3.msra.mxu0 %v2471_v17 }
 0x5ef   : > { %2980 = vmatprep.subr.mxu0 %v3140_v7 }
 0x5f0   : > { %2981 = vmatpush3.msra.mxu0 %v2470_v18 }
 0x5f1   : > { %2982 = vmatprep.subr.mxu0 %v3140_v7 }
 0x5f2   : > { %2983 = vmatpush3.msra.mxu0 %v2469_v19 }
 0x5f3   : > { %2984 = vmatprep.subr.mxu0 %v3140_v7 }
 0x5f4   : > { %2985 = vmatpush3.msra.mxu0 %v2468_v20 }
 0x5f5   : > { %2986 = vmatprep.subr.mxu0 %v3140_v7 }
 0x5f6   : > { %2987 = vmatpush3.msra.mxu0 %v2467_v21 }
 0x5f7   : > { %2988 = vmatprep.subr.mxu0 %v3140_v7 }
 0x5f8   : > { %2989 = vmatpush3.msra.mxu0 %v2466_v22 }
 0x5f9   : > { %2990 = vmatprep.subr.mxu0 %v3140_v7 }
 0x5fa   : > { %2991 = vmatpush3.msra.mxu0 %v2465_v23 }
 0x5fb   : > { %2992 = vmatprep.subr.mxu0 %v3140_v7 }
 0x5fc   : > { %2993 = vmatpush3.msra.mxu0 %v2464_v24 }
 0x5fd   : > { %2994 = vmatprep.subr.mxu0 %v3140_v7 }
 0x5fe   : > { %2995 = vmatpush3.msra.mxu0 %v2463_v25 }
 0x5ff   : > { %2996 = vmatprep.subr.mxu0 %v3140_v7 }
 0x600   : > { %2997 = vmatpush3.msra.mxu0 %v2462_v26 }
 0x601   : > { %2998 = vmatprep.subr.mxu0 %v3140_v7 }
 0x602   : > { %2999 = vmatpush3.msra.mxu0 %v2461_v27 }
 0x603   : > { %3000 = vmatprep.subr.mxu0 %v3140_v7 }
 0x604   : > { %3001 = vmatpush3.msra.mxu0 %v2460_v28 }
 0x605   : > { %3002 = vmatprep.subr.mxu0 %v3140_v7 }
 0x606   : > { %3003 = vmatpush3.msra.mxu0 %v2459_v29 }
 0x6a7   : > { %v2333_v54 = vpop.f32.mrf.mxu0 }
 0x6a8   : > { %v2334_v55 = vadd.f32 %v2663_v53, %v2333_v54 }
 0x6a9   : > { %v2960_v56 = vpop.f32.mrf.mxu0 }
 0x6aa   : > { %v3625_v57 = vadd.f32 %v2334_v55, %v3295_v0  ;;  %v2369_v0 = vld [vmem:[%s3772_s14 + $0x10] sm:$0xff] }
 0x6ab   : > { %2964 = vmatpush3.msra.mxu1 %v2369_v0 }
 0x6ac   : > { %v2340_v58 = vsel %vm574_vm0, %v3625_v57, 0.0  ;;  %2965 = vmatprep.subr.mxu1 %v3140_v7 }
 0x6ad   : > { %2341 = vadd.xlane.f32.xlu1 %v2340_v58  ;;  %2966 = vmatpush3.msra.mxu1 %v2368_v2 }
 0x6ae   : > { %2967 = vmatprep.subr.mxu1 %v3140_v7  ;;  %v2670_v7 = vld [vmem:[%s3775_s17] ss:$0 sm:$0xff] }
 0x6af   : > { %2968 = vmatpush3.msra.mxu1 %v2367_v3 }
 0x736   : > { %v2342_v59 = vpop.xlane.xlu1 %2341 }
 0x737   : > { %v2343_v60 = vmul.f32 0.03125, %v2342_v59 }
 0x739   : > { %v2344_v61 = vsub.f32 %v3625_v57, %v2343_v60 }
 0x73b   : > { %v2345_v62 = vmul.f32 %v2344_v61, %v2344_v61 }
 0x73d   : > { %v2346_v63 = vsel %vm574_vm0, %v2345_v62, 0.0 }
 0x73e   : > { %2347 = vadd.xlane.f32.xlu0 %v2346_v63 }
 0x7c7   : > { %v2348_v4 = vpop.xlane.xlu0 %2347 }
 0x7c8   : > { %v2349_v5 = vmul.f32 0.03125, %v2348_v4 }
 0x7ca   : > { %v2350_v6 = vadd.f32 1e-05, %v2349_v5 }
 0x7cc   : > { %3072 = vrsqrt.f32 %v2350_v6 }
 0x7d9   : > { %v3073_v8 = vpop.eup %3072 }
 0x7da   : > { %v2352_v10 = vmul.f32 %v3073_v8, %v2344_v61 }
 0x7dc   : > { %v2359_v12 = vmul.f32 %v2665_v9, %v2352_v10 }
 0x7de   : > { %v2366_v13 = vadd.f32 %v2666_v11, %v2359_v12 }
 0x7e0   : > { %2970 = vmatmul.mubr.msk.f32.vlgmr.msra.gmra.mxu1 %vm574_vm0, %v2366_v13 }
 0x8a0   : > { %v2447_v31 = vpop.f32.mrf.mxu1 }
 0x8a1   : > { %v2448_v32 = vadd.f32 %v2667_v30, %v2447_v31 }
 0x8a2   : > { %v2971_v33 = vpop.f32.mrf.mxu1 }
 0x8a3   : > { %v2669_v34 = vmul.f32 -1.702, %v2448_v32 }
 0x8a5   : > { %v2453_v35 = vmul.f32 1.442695, %v2669_v34 }
 0x8a7   : > { %3074 = vpow2.f32 %v2453_v35 }
 0x8b4   : > { %v3075_v36 = vpop.eup %3074 }
 0x8b5   : > { %v2455_v37 = vadd.f32 1.0, %v3075_v36 }
 0x8b7   : > { %3076 = vrcp.f32 %v2455_v37 }
 0x8c4   : > { %v3077_v38 = vpop.eup %3076 }
 0x8c5   : > { %v2458_v39 = vmul.f32 %v3077_v38, %v2448_v32 }
 0x8c7   : > { %3005 = vmatmul.mubr.f32.vlgmr.msra.gmra.mxu0 %v2458_v39 }
 0x987   : > { %v2548_v40 = vpop.f32.mrf.mxu0 }
 0x988   : > { %v2549_v41 = vadd.f32 %v2670_v7, %v2548_v40 }
 0x989   : > { %v3006_v42 = vpop.f32.mrf.mxu0 }
 0x98a   : > { %v2552_v43 = vadd.f32 %v2549_v41, %v3625_v57 }
 0x98c   : > { %2553 = vst.msk [vmem:[%s566_s25] sm:$0xff] %vm574_vm0, %v2552_v43 }
 0x98d   : > { %3091 = shalt.err (!%p3088_p3)
}
 0x98e   : > { %s3092_s3 = scalar_lea.hbm %s2566_s4, 128  ;;  %s3096_s26 = scalar_lea.hbm %s3776_s18, 256 }
 0x98f   : > { %p3093_p4 = scmp.ne.s32.totalorder %s2566_s4, %s3092_s3  ;;  %p3097_p9 = scmp.lt.s32.totalorder %s2566_s4, %s3776_s18 }
 0x990   : > { %p3098_p10 = scmp.lt.s32.totalorder %s3096_s26, %s3092_s3 }
 0x991   : > { %p3094_p7 = pnand %p3093_p4, %p3280_p5 }
 0x992   : > { %p3099_p11 = por %p3098_p10, %p3097_p9 }
 0x993   : > { %p3095_p8 = pneg %p3094_p7 }
 0x995   : > { %p3100_p12 = pnand %p3099_p11, %p3095_p8 }
 0x997   : > { %3103 = shalt.err (!%p3100_p12)
}
 0x998   : > { %3007 = dma.vmem_to_hbm [thread:$0]  (%p3280_p5), %s2569_s19, 128, %s2566_s4, %s2555_s5  }
 0x999 PF: > { %p3013_p13 = scmp.ge.s32.totalorder %s3138_s30, 2  ;;  %s2580_s6 = sand.u32 1, %s3126_s27  }
 0x99a   : > { %s2581_s0 = scalar_lea.sflag [#allocation3], %s2580_s6 }
 0x99b   : > { %p3010_p0 = pnand %p3013_p13, %p3284_p6 }
 0x99d   : > { %p3011_p1 = pneg %p3010_p0 }
 0x99f   : > { %3121 = dma.done.wait (%p3011_p1), %s2581_s0, 128  }
 0x9a0   : > { %3123 = vsyncadd (%p3011_p1), %s2581_s0, 4294967168  ;;  %s3796_s21 = sld [smem:[#allocation5_spill]]  ;;  %p28_p2 = scmp.ge.s32.totalorder %s3267_s1, 4  }
 0x9a1   : > { %s3797_s29 = sld [smem:[#allocation6_spill]]  ;;  %s3798_s27 = smov %s3130_s28 }
 0x9a2   : > { %s3800_s30 = smov %s3267_s1  ;;  %30 = sbr.rel (!%p28_p2) target bundleno = 11 (0xb), region = 127 }
 0x9a6   : > { %s3799_s28 = smov %s3796_s21 }
 0x9a7   :  { %2586 = vsyncpa [#allocation3], 1 }
 0x9a8   :  { %2588 = vsyncpa [#allocation3 + $0x1], 1 }

</bundles_post_ra>
